<compile_context>
chip_gen: v7x
topology: tpu7x:2x2x1
jax: 0.10.0
libtpu: 0.0.40
codegen_flags: <defaults>
</compile_context>

<pallas_src>
import functools

import jax
import jax.numpy as jnp
from jax import lax
from jax.experimental import pallas as pl
from jax.experimental.pallas import tpu as pltpu


def _round_up(x, m):
    return (x + m - 1) // m * m


def _largest_divisor_leq(n, cap):
    cap = max(1, min(int(cap), n))
    for d in range(cap, 0, -1):
        if n % d == 0:
            return d
    return 1


def _pick_tile_ho(Ho, Wo, C, budget_bytes=4 << 20):
    """Largest output-row tile whose input phase blocks fit a small VMEM budget."""
    # Per output row the kernel holds ~2 (even+odd) padded phase rows per column
    # parity, bf16, channel dim padded to the 128-lane vreg width.
    row_bytes = 2 * 2 * _round_up(Wo + 1, 16) * _round_up(C, 128) * 2
    max_rows = max(1, budget_bytes // max(row_bytes, 1))
    return _largest_divisor_leq(Ho, max_rows)


def _vmem_block_bytes(shape, dtype):
    item = jnp.dtype(dtype).itemsize
    s = list(shape)
    s[-1] = _round_up(s[-1], 128)
    if len(s) >= 2:
        s[-2] = _round_up(s[-2], 8 * max(1, 4 // item))
    n = item
    for d in s:
        n *= int(d)
    return n


# ---------------------------------------------------------------------------
# Fused stride-2 3x3 conv kernel (one (batch, output-row-tile) block per step)
# ---------------------------------------------------------------------------

def _make_downsample_kernel(tho, Wo, C, O, use_mxu):
    """Ref shapes (batch/tile dims squeezed away by the BlockSpecs):

      ee_ref: [tho+1, Wo+1, C]  even padded rows, even padded cols (+1-row halo)
      eo_ref: [tho+1, Wo,   C]  even rows, odd cols
      oe_ref: [tho,   Wo+1, C]  odd rows, even cols
      oo_ref: [tho,   Wo,   C]  odd rows, odd cols
      w_ref : [9, C, O] bf16    tap-major weights (tap = 3*dh + dw)
      b_ref : [1, O]   f32      bias
      o_ref : [tho, Wo, O]      this tile's output rows (NHWC)
    """

    def kernel(ee_ref, eo_ref, oe_ref, oo_ref, w_ref, b_ref, o_ref):
        phase = {(0, 0): ee_ref, (0, 1): eo_ref, (1, 0): oe_ref, (1, 1): oo_ref}
        w_all = w_ref[...]
        if not use_mxu:
            w_all = w_all.astype(jnp.float32)
        bias = b_ref[...]                                   # [1, O] f32

        def row_body(r, carry):
            acc = jnp.zeros((Wo, O), jnp.float32)
            for dh in range(3):
                for dw in range(3):
                    src = phase[(dh % 2, dw % 2)]
                    # padded input pixel (2*ho + dh, 2*wo + dw) == unit-stride
                    # slice of the (dh%2, dw%2) phase at offsets (dh//2, dw//2).
                    lhs = src[r + dh // 2, pl.ds(dw // 2, Wo), :]    # [Wo, C]
                    wt = w_all[3 * dh + dw]                          # [C, O]
                    if use_mxu:
                        acc = acc + jnp.dot(lhs, wt,
                                            preferred_element_type=jnp.float32)
                    else:
                        # Tiny-channel path: VPU broadcast-FMAs, no MXU
                        # 128-lane padding waste when C/O are tiny.
                        lhs32 = lhs.astype(jnp.float32)
                        for c in range(C):
                            acc = acc + lhs32[:, c:c + 1] * wt[c:c + 1, :]
            o_ref[r] = (acc + bias).astype(o_ref.dtype)
            return carry

        lax.fori_loop(0, tho, row_body, 0)

    return kernel


# ---------------------------------------------------------------------------
# DownSample forward: Conv2d(n_ch, n_ch, kernel=3, stride=2, padding=1)
# ---------------------------------------------------------------------------

def downsample_forward(params, x, t, *, tile_ho=None, out_dtype=None):
    """Matches DownSample.forward: `t` is ignored, x is NCHW."""
    del t
    w, b = params["w"], params["b"]                  # [O, C, 3, 3], [O]
    B, C, H, W = x.shape
    O = w.shape[0]
    Ho = (H - 1) // 2 + 1
    Wo = (W - 1) // 2 + 1
    out_dtype = jnp.dtype(x.dtype) if out_dtype is None else jnp.dtype(out_dtype)

    # -- single cheap reorg pass over x: NHWC, pad, bf16, 2x2 phase split -----
    xp = jnp.pad(x.transpose(0, 2, 3, 1),
                 ((0, 0), (1, 1), (1, 1), (0, 0))).astype(jnp.bfloat16)
    x_ee = xp[:, 0::2, 0::2, :][:, :Ho + 1, :Wo + 1, :]
    x_eo = xp[:, 0::2, 1::2, :][:, :Ho + 1, :Wo, :]
    x_oe = xp[:, 1::2, 0::2, :][:, :Ho, :Wo + 1, :]
    x_oo = xp[:, 1::2, 1::2, :][:, :Ho, :Wo, :]

    # -- output-row tile: largest that keeps blocks comfortably in VMEM -------
    if tile_ho is None:
        tho = _pick_tile_ho(Ho, Wo, C)
    else:
        tho = _largest_divisor_leq(Ho, tile_ho)
    n_t = Ho // tho

    # dh==2 taps need one extra even-phase row per tile; materialize that
    # 1-row halo once (duplicates ~1/tho of the even rows) so plain Blocked
    # BlockSpecs + the auto double-buffered pipeline can be used.
    # TODO(synk): replace with an in-kernel manual halo DMA (memory_space=pl.ANY)
    # to drop this gather pass entirely.
    ridx = jnp.arange(n_t)[:, None] * tho + jnp.arange(tho + 1)[None, :]
    ee_t = x_ee[:, ridx]                                   # [B, n_t, tho+1, Wo+1, C]
    eo_t = x_eo[:, ridx]                                   # [B, n_t, tho+1, Wo,   C]
    oe_t = x_oe.reshape(B, n_t, tho, Wo + 1, C)
    oo_t = x_oo.reshape(B, n_t, tho, Wo, C)

    # Weights [O, C, 3, 3] -> tap-major [9, C, O] (tap = 3*kh + kw); bias f32.
    wk = w.transpose(2, 3, 1, 0).reshape(9, C, O).astype(jnp.bfloat16)
    bk = b.astype(jnp.float32).reshape(1, O)

    use_mxu = C > 8
    kernel = _make_downsample_kernel(tho, Wo, C, O, use_mxu)

    in_specs = [
        pl.BlockSpec((None, None, tho + 1, Wo + 1, C), lambda bi, j: (bi, j, 0, 0, 0)),
        pl.BlockSpec((None, None, tho + 1, Wo, C), lambda bi, j: (bi, j, 0, 0, 0)),
        pl.BlockSpec((None, None, tho, Wo + 1, C), lambda bi, j: (bi, j, 0, 0, 0)),
        pl.BlockSpec((None, None, tho, Wo, C), lambda bi, j: (bi, j, 0, 0, 0)),
        pl.BlockSpec((9, C, O), lambda bi, j: (0, 0, 0)),
        pl.BlockSpec((1, O), lambda bi, j: (0, 0)),
    ]
    out_spec = pl.BlockSpec((None, tho, Wo, O), lambda bi, j: (bi, j, 0, 0))

    block_bytes = (
        _vmem_block_bytes((tho + 1, Wo + 1, C), jnp.bfloat16)
        + _vmem_block_bytes((tho + 1, Wo, C), jnp.bfloat16)
        + _vmem_block_bytes((tho, Wo + 1, C), jnp.bfloat16)
        + _vmem_block_bytes((tho, Wo, C), jnp.bfloat16)
        + _vmem_block_bytes((9, C, O), jnp.bfloat16)
        + _vmem_block_bytes((1, O), jnp.float32)
        + _vmem_block_bytes((tho, Wo, O), out_dtype)
    )
    # Double-buffered blocks + slack; stays well under v7x's 64 MiB/TC.
    vmem_limit = int(min(96 << 20, max(32 << 20, 3 * block_bytes)))

    y = pl.pallas_call(
        kernel,
        out_shape=jax.ShapeDtypeStruct((B, Ho, Wo, O), out_dtype),
        grid_spec=pltpu.PrefetchScalarGridSpec(
            num_scalar_prefetch=0,
            grid=(B, n_t),
            in_specs=in_specs,
            out_specs=out_spec,
        ),
        compiler_params=pltpu.CompilerParams(
            dimension_semantics=("parallel", "parallel"),
            vmem_limit_bytes=vmem_limit,
        ),
    )(ee_t, eo_t, oe_t, oo_t, wk, bk)

    # Back to NCHW to match DownSample.forward's output layout.
    # TODO(synk): keep the model NHWC end-to-end to drop this transpose.
    return y.transpose(0, 3, 1, 2)


# ---------------------------------------------------------------------------
# Driver
# ---------------------------------------------------------------------------

if __name__ == "__main__":
    key = jax.random.PRNGKey(0)
    kw, kb, kx = jax.random.split(key, 3)

    B, n_ch, H, W = 2, 4, 16, 16
    params = {
        "w": 0.05 * jax.random.normal(kw, (n_ch, n_ch, 3, 3), jnp.float32),
        "b": 0.01 * jax.random.normal(kb, (n_ch,), jnp.float32),
    }
    x = jax.random.normal(kx, (B, n_ch, H, W), jnp.float32)
    t = jnp.arange(B, dtype=jnp.float32)     # ignored by the forward pass

    # tile_ho=4 -> 2 output-row tiles per image: exercises the halo-tiled path
    # and keeps both "parallel" grid axes at >= 2 blocks (v7x megacore).
    fwd = jax.jit(functools.partial(downsample_forward, params, tile_ho=4))
    out = fwd(x, t)
    jax.block_until_ready(out)

    assert out.shape == (B, n_ch, H // 2, W // 2), out.shape
    assert bool(jnp.all(jnp.isfinite(out)))

    # Reference check vs XLA conv (bf16 storage of x/w => relaxed tolerance).
    ref = jax.lax.conv_general_dilated(
        x, params["w"], window_strides=(2, 2), padding=((1, 1), (1, 1)),
        dimension_numbers=("NCHW", "OIHW", "NCHW"),
    ) + params["b"].reshape(1, -1, 1, 1)
    err = float(jnp.max(jnp.abs(out - ref)))
    assert err < 5e-2, f"max abs err {err}"

    print("KERNEL_OK")
</pallas_src>

<mosaic_0001>
module attributes {stable_mosaic.version = 11 : i64} {
  func.func @kernel(%arg0: i32, %arg1: i32, %arg2: memref<1x1x5x9x4xbf16, #tpu.memory_space<vmem>>, %arg3: memref<1x1x5x8x4xbf16, #tpu.memory_space<vmem>>, %arg4: memref<1x1x4x9x4xbf16, #tpu.memory_space<vmem>>, %arg5: memref<1x1x4x8x4xbf16, #tpu.memory_space<vmem>>, %arg6: memref<9x4x4xbf16, #tpu.memory_space<vmem>>, %arg7: memref<1x4xf32, #tpu.memory_space<vmem>>, %arg8: memref<1x4x8x4xf32, #tpu.memory_space<vmem>>) attributes {dimension_semantics = [#tpu.dimension_semantics<parallel>, #tpu.dimension_semantics<parallel>], iteration_bounds = array<i64: 2, 2>, scalar_prefetch = 0 : i64, scratch_operands = 0 : i64, tpu.core_type = #tpu.core_type<tc>, window_params = [{transform_indices = @transform_0, window_bounds = array<i64: 1, 1, 5, 9, 4>}, {transform_indices = @transform_1, window_bounds = array<i64: 1, 1, 5, 8, 4>}, {transform_indices = @transform_2, window_bounds = array<i64: 1, 1, 4, 9, 4>}, {transform_indices = @transform_3, window_bounds = array<i64: 1, 1, 4, 8, 4>}, {pipeline_mode = #tpu.pipeline_mode<synchronous>, transform_indices = @transform_4, window_bounds = array<i64: 9, 4, 4>}, {pipeline_mode = #tpu.pipeline_mode<synchronous>, transform_indices = @transform_5, window_bounds = array<i64: 1, 4>}, {transform_indices = @transform_6, window_bounds = array<i64: 1, 4, 8, 4>}]} {
    %c0 = arith.constant 0 : index
    %c0_0 = arith.constant 0 : index
    %c0_1 = arith.constant 0 : index
    %0 = vector.load %arg6[%c0, %c0_0, %c0_1] : memref<9x4x4xbf16, #tpu.memory_space<vmem>>, vector<9x4x4xbf16>
    %1 = arith.extf %0 : vector<9x4x4xbf16> to vector<9x4x4xf32>
    %c0_2 = arith.constant 0 : index
    %c0_3 = arith.constant 0 : index
    %2 = vector.load %arg7[%c0_2, %c0_3] : memref<1x4xf32, #tpu.memory_space<vmem>>, vector<1x4xf32>
    %c0_i32 = arith.constant 0 : i32
    %c4_i32 = arith.constant 4 : i32
    %3 = arith.addi %c0_i32, %c4_i32 : i32
    %c1_i32 = arith.constant 1 : i32
    scf.for %arg9 = %c0_i32 to %3 step %c1_i32  : i32 {
      %cst = arith.constant 0.000000e+00 : f32
      %4 = vector.broadcast %cst : f32 to vector<8x4xf32>
      %c0_i32_5 = arith.constant 0 : i32
      %5 = arith.addi %arg9, %c0_i32_5 : i32
      %c0_6 = arith.constant 0 : index
      %c0_7 = arith.constant 0 : index
      %6 = arith.index_cast %5 : i32 to index
      %c0_8 = arith.constant 0 : index
      %c0_9 = arith.constant 0 : index
      %7 = vector.load %arg2[%c0_6, %c0_7, %6, %c0_8, %c0_9] : memref<1x1x5x9x4xbf16, #tpu.memory_space<vmem>>, vector<1x1x1x8x4xbf16>
      %8 = vector.shape_cast %7 : vector<1x1x1x8x4xbf16> to vector<8x4xbf16>
      %9 = vector.extract_strided_slice %1 {offsets = [0, 0, 0], sizes = [1, 4, 4], strides = [1, 1, 1]} : vector<9x4x4xf32> to vector<1x4x4xf32>
      %10 = vector.shape_cast %9 : vector<1x4x4xf32> to vector<4x4xf32>
      %11 = arith.extf %8 : vector<8x4xbf16> to vector<8x4xf32>
      %12 = vector.extract_strided_slice %11 {offsets = [0, 0], sizes = [8, 1], strides = [1, 1]} : vector<8x4xf32> to vector<8x1xf32>
      %13 = vector.extract_strided_slice %10 {offsets = [0, 0], sizes = [1, 4], strides = [1, 1]} : vector<4x4xf32> to vector<1x4xf32>
      %14 = vector.broadcast %12 : vector<8x1xf32> to vector<8x4xf32>
      %15 = vector.broadcast %13 : vector<1x4xf32> to vector<8x4xf32>
      %16 = arith.mulf %14, %15 : vector<8x4xf32>
      %17 = arith.addf %4, %16 : vector<8x4xf32>
      %18 = vector.extract_strided_slice %11 {offsets = [0, 1], sizes = [8, 1], strides = [1, 1]} : vector<8x4xf32> to vector<8x1xf32>
      %19 = vector.extract_strided_slice %10 {offsets = [1, 0], sizes = [1, 4], strides = [1, 1]} : vector<4x4xf32> to vector<1x4xf32>
      %20 = vector.broadcast %18 : vector<8x1xf32> to vector<8x4xf32>
      %21 = vector.broadcast %19 : vector<1x4xf32> to vector<8x4xf32>
      %22 = arith.mulf %20, %21 : vector<8x4xf32>
      %23 = arith.addf %17, %22 : vector<8x4xf32>
      %24 = vector.extract_strided_slice %11 {offsets = [0, 2], sizes = [8, 1], strides = [1, 1]} : vector<8x4xf32> to vector<8x1xf32>
      %25 = vector.extract_strided_slice %10 {offsets = [2, 0], sizes = [1, 4], strides = [1, 1]} : vector<4x4xf32> to vector<1x4xf32>
      %26 = vector.broadcast %24 : vector<8x1xf32> to vector<8x4xf32>
      %27 = vector.broadcast %25 : vector<1x4xf32> to vector<8x4xf32>
      %28 = arith.mulf %26, %27 : vector<8x4xf32>
      %29 = arith.addf %23, %28 : vector<8x4xf32>
      %30 = vector.extract_strided_slice %11 {offsets = [0, 3], sizes = [8, 1], strides = [1, 1]} : vector<8x4xf32> to vector<8x1xf32>
      %31 = vector.extract_strided_slice %10 {offsets = [3, 0], sizes = [1, 4], strides = [1, 1]} : vector<4x4xf32> to vector<1x4xf32>
      %32 = vector.broadcast %30 : vector<8x1xf32> to vector<8x4xf32>
      %33 = vector.broadcast %31 : vector<1x4xf32> to vector<8x4xf32>
      %34 = arith.mulf %32, %33 : vector<8x4xf32>
      %35 = arith.addf %29, %34 : vector<8x4xf32>
      %c0_i32_10 = arith.constant 0 : i32
      %36 = arith.addi %arg9, %c0_i32_10 : i32
      %c0_11 = arith.constant 0 : index
      %c0_12 = arith.constant 0 : index
      %37 = arith.index_cast %36 : i32 to index
      %c0_13 = arith.constant 0 : index
      %c0_14 = arith.constant 0 : index
      %38 = vector.load %arg3[%c0_11, %c0_12, %37, %c0_13, %c0_14] : memref<1x1x5x8x4xbf16, #tpu.memory_space<vmem>>, vector<1x1x1x8x4xbf16>
      %39 = vector.shape_cast %38 : vector<1x1x1x8x4xbf16> to vector<8x4xbf16>
      %40 = vector.extract_strided_slice %1 {offsets = [1, 0, 0], sizes = [1, 4, 4], strides = [1, 1, 1]} : vector<9x4x4xf32> to vector<1x4x4xf32>
      %41 = vector.shape_cast %40 : vector<1x4x4xf32> to vector<4x4xf32>
      %42 = arith.extf %39 : vector<8x4xbf16> to vector<8x4xf32>
      %43 = vector.extract_strided_slice %42 {offsets = [0, 0], sizes = [8, 1], strides = [1, 1]} : vector<8x4xf32> to vector<8x1xf32>
      %44 = vector.extract_strided_slice %41 {offsets = [0, 0], sizes = [1, 4], strides = [1, 1]} : vector<4x4xf32> to vector<1x4xf32>
      %45 = vector.broadcast %43 : vector<8x1xf32> to vector<8x4xf32>
      %46 = vector.broadcast %44 : vector<1x4xf32> to vector<8x4xf32>
      %47 = arith.mulf %45, %46 : vector<8x4xf32>
      %48 = arith.addf %35, %47 : vector<8x4xf32>
      %49 = vector.extract_strided_slice %42 {offsets = [0, 1], sizes = [8, 1], strides = [1, 1]} : vector<8x4xf32> to vector<8x1xf32>
      %50 = vector.extract_strided_slice %41 {offsets = [1, 0], sizes = [1, 4], strides = [1, 1]} : vector<4x4xf32> to vector<1x4xf32>
      %51 = vector.broadcast %49 : vector<8x1xf32> to vector<8x4xf32>
      %52 = vector.broadcast %50 : vector<1x4xf32> to vector<8x4xf32>
      %53 = arith.mulf %51, %52 : vector<8x4xf32>
      %54 = arith.addf %48, %53 : vector<8x4xf32>
      %55 = vector.extract_strided_slice %42 {offsets = [0, 2], sizes = [8, 1], strides = [1, 1]} : vector<8x4xf32> to vector<8x1xf32>
      %56 = vector.extract_strided_slice %41 {offsets = [2, 0], sizes = [1, 4], strides = [1, 1]} : vector<4x4xf32> to vector<1x4xf32>
      %57 = vector.broadcast %55 : vector<8x1xf32> to vector<8x4xf32>
      %58 = vector.broadcast %56 : vector<1x4xf32> to vector<8x4xf32>
      %59 = arith.mulf %57, %58 : vector<8x4xf32>
      %60 = arith.addf %54, %59 : vector<8x4xf32>
      %61 = vector.extract_strided_slice %42 {offsets = [0, 3], sizes = [8, 1], strides = [1, 1]} : vector<8x4xf32> to vector<8x1xf32>
      %62 = vector.extract_strided_slice %41 {offsets = [3, 0], sizes = [1, 4], strides = [1, 1]} : vector<4x4xf32> to vector<1x4xf32>
      %63 = vector.broadcast %61 : vector<8x1xf32> to vector<8x4xf32>
      %64 = vector.broadcast %62 : vector<1x4xf32> to vector<8x4xf32>
      %65 = arith.mulf %63, %64 : vector<8x4xf32>
      %66 = arith.addf %60, %65 : vector<8x4xf32>
      %c0_i32_15 = arith.constant 0 : i32
      %67 = arith.addi %arg9, %c0_i32_15 : i32
      %c0_16 = arith.constant 0 : index
      %c0_17 = arith.constant 0 : index
      %68 = arith.index_cast %67 : i32 to index
      %c1 = arith.constant 1 : index
      %c0_18 = arith.constant 0 : index
      %69 = vector.load %arg2[%c0_16, %c0_17, %68, %c1, %c0_18] : memref<1x1x5x9x4xbf16, #tpu.memory_space<vmem>>, vector<1x1x1x8x4xbf16>
      %70 = vector.shape_cast %69 : vector<1x1x1x8x4xbf16> to vector<8x4xbf16>
      %71 = vector.extract_strided_slice %1 {offsets = [2, 0, 0], sizes = [1, 4, 4], strides = [1, 1, 1]} : vector<9x4x4xf32> to vector<1x4x4xf32>
      %72 = vector.shape_cast %71 : vector<1x4x4xf32> to vector<4x4xf32>
      %73 = arith.extf %70 : vector<8x4xbf16> to vector<8x4xf32>
      %74 = vector.extract_strided_slice %73 {offsets = [0, 0], sizes = [8, 1], strides = [1, 1]} : vector<8x4xf32> to vector<8x1xf32>
      %75 = vector.extract_strided_slice %72 {offsets = [0, 0], sizes = [1, 4], strides = [1, 1]} : vector<4x4xf32> to vector<1x4xf32>
      %76 = vector.broadcast %74 : vector<8x1xf32> to vector<8x4xf32>
      %77 = vector.broadcast %75 : vector<1x4xf32> to vector<8x4xf32>
      %78 = arith.mulf %76, %77 : vector<8x4xf32>
      %79 = arith.addf %66, %78 : vector<8x4xf32>
      %80 = vector.extract_strided_slice %73 {offsets = [0, 1], sizes = [8, 1], strides = [1, 1]} : vector<8x4xf32> to vector<8x1xf32>
      %81 = vector.extract_strided_slice %72 {offsets = [1, 0], sizes = [1, 4], strides = [1, 1]} : vector<4x4xf32> to vector<1x4xf32>
      %82 = vector.broadcast %80 : vector<8x1xf32> to vector<8x4xf32>
      %83 = vector.broadcast %81 : vector<1x4xf32> to vector<8x4xf32>
      %84 = arith.mulf %82, %83 : vector<8x4xf32>
      %85 = arith.addf %79, %84 : vector<8x4xf32>
      %86 = vector.extract_strided_slice %73 {offsets = [0, 2], sizes = [8, 1], strides = [1, 1]} : vector<8x4xf32> to vector<8x1xf32>
      %87 = vector.extract_strided_slice %72 {offsets = [2, 0], sizes = [1, 4], strides = [1, 1]} : vector<4x4xf32> to vector<1x4xf32>
      %88 = vector.broadcast %86 : vector<8x1xf32> to vector<8x4xf32>
      %89 = vector.broadcast %87 : vector<1x4xf32> to vector<8x4xf32>
      %90 = arith.mulf %88, %89 : vector<8x4xf32>
      %91 = arith.addf %85, %90 : vector<8x4xf32>
      %92 = vector.extract_strided_slice %73 {offsets = [0, 3], sizes = [8, 1], strides = [1, 1]} : vector<8x4xf32> to vector<8x1xf32>
      %93 = vector.extract_strided_slice %72 {offsets = [3, 0], sizes = [1, 4], strides = [1, 1]} : vector<4x4xf32> to vector<1x4xf32>
      %94 = vector.broadcast %92 : vector<8x1xf32> to vector<8x4xf32>
      %95 = vector.broadcast %93 : vector<1x4xf32> to vector<8x4xf32>
      %96 = arith.mulf %94, %95 : vector<8x4xf32>
      %97 = arith.addf %91, %96 : vector<8x4xf32>
      %c0_i32_19 = arith.constant 0 : i32
      %98 = arith.addi %arg9, %c0_i32_19 : i32
      %c0_20 = arith.constant 0 : index
      %c0_21 = arith.constant 0 : index
      %99 = arith.index_cast %98 : i32 to index
      %c0_22 = arith.constant 0 : index
      %c0_23 = arith.constant 0 : index
      %100 = vector.load %arg4[%c0_20, %c0_21, %99, %c0_22, %c0_23] : memref<1x1x4x9x4xbf16, #tpu.memory_space<vmem>>, vector<1x1x1x8x4xbf16>
      %101 = vector.shape_cast %100 : vector<1x1x1x8x4xbf16> to vector<8x4xbf16>
      %102 = vector.extract_strided_slice %1 {offsets = [3, 0, 0], sizes = [1, 4, 4], strides = [1, 1, 1]} : vector<9x4x4xf32> to vector<1x4x4xf32>
      %103 = vector.shape_cast %102 : vector<1x4x4xf32> to vector<4x4xf32>
      %104 = arith.extf %101 : vector<8x4xbf16> to vector<8x4xf32>
      %105 = vector.extract_strided_slice %104 {offsets = [0, 0], sizes = [8, 1], strides = [1, 1]} : vector<8x4xf32> to vector<8x1xf32>
      %106 = vector.extract_strided_slice %103 {offsets = [0, 0], sizes = [1, 4], strides = [1, 1]} : vector<4x4xf32> to vector<1x4xf32>
      %107 = vector.broadcast %105 : vector<8x1xf32> to vector<8x4xf32>
      %108 = vector.broadcast %106 : vector<1x4xf32> to vector<8x4xf32>
      %109 = arith.mulf %107, %108 : vector<8x4xf32>
      %110 = arith.addf %97, %109 : vector<8x4xf32>
      %111 = vector.extract_strided_slice %104 {offsets = [0, 1], sizes = [8, 1], strides = [1, 1]} : vector<8x4xf32> to vector<8x1xf32>
      %112 = vector.extract_strided_slice %103 {offsets = [1, 0], sizes = [1, 4], strides = [1, 1]} : vector<4x4xf32> to vector<1x4xf32>
      %113 = vector.broadcast %111 : vector<8x1xf32> to vector<8x4xf32>
      %114 = vector.broadcast %112 : vector<1x4xf32> to vector<8x4xf32>
      %115 = arith.mulf %113, %114 : vector<8x4xf32>
      %116 = arith.addf %110, %115 : vector<8x4xf32>
      %117 = vector.extract_strided_slice %104 {offsets = [0, 2], sizes = [8, 1], strides = [1, 1]} : vector<8x4xf32> to vector<8x1xf32>
      %118 = vector.extract_strided_slice %103 {offsets = [2, 0], sizes = [1, 4], strides = [1, 1]} : vector<4x4xf32> to vector<1x4xf32>
      %119 = vector.broadcast %117 : vector<8x1xf32> to vector<8x4xf32>
      %120 = vector.broadcast %118 : vector<1x4xf32> to vector<8x4xf32>
      %121 = arith.mulf %119, %120 : vector<8x4xf32>
      %122 = arith.addf %116, %121 : vector<8x4xf32>
      %123 = vector.extract_strided_slice %104 {offsets = [0, 3], sizes = [8, 1], strides = [1, 1]} : vector<8x4xf32> to vector<8x1xf32>
      %124 = vector.extract_strided_slice %103 {offsets = [3, 0], sizes = [1, 4], strides = [1, 1]} : vector<4x4xf32> to vector<1x4xf32>
      %125 = vector.broadcast %123 : vector<8x1xf32> to vector<8x4xf32>
      %126 = vector.broadcast %124 : vector<1x4xf32> to vector<8x4xf32>
      %127 = arith.mulf %125, %126 : vector<8x4xf32>
      %128 = arith.addf %122, %127 : vector<8x4xf32>
      %c0_i32_24 = arith.constant 0 : i32
      %129 = arith.addi %arg9, %c0_i32_24 : i32
      %c0_25 = arith.constant 0 : index
      %c0_26 = arith.constant 0 : index
      %130 = arith.index_cast %129 : i32 to index
      %c0_27 = arith.constant 0 : index
      %c0_28 = arith.constant 0 : index
      %131 = vector.load %arg5[%c0_25, %c0_26, %130, %c0_27, %c0_28] : memref<1x1x4x8x4xbf16, #tpu.memory_space<vmem>>, vector<1x1x1x8x4xbf16>
      %132 = vector.shape_cast %131 : vector<1x1x1x8x4xbf16> to vector<8x4xbf16>
      %133 = vector.extract_strided_slice %1 {offsets = [4, 0, 0], sizes = [1, 4, 4], strides = [1, 1, 1]} : vector<9x4x4xf32> to vector<1x4x4xf32>
      %134 = vector.shape_cast %133 : vector<1x4x4xf32> to vector<4x4xf32>
      %135 = arith.extf %132 : vector<8x4xbf16> to vector<8x4xf32>
      %136 = vector.extract_strided_slice %135 {offsets = [0, 0], sizes = [8, 1], strides = [1, 1]} : vector<8x4xf32> to vector<8x1xf32>
      %137 = vector.extract_strided_slice %134 {offsets = [0, 0], sizes = [1, 4], strides = [1, 1]} : vector<4x4xf32> to vector<1x4xf32>
      %138 = vector.broadcast %136 : vector<8x1xf32> to vector<8x4xf32>
      %139 = vector.broadcast %137 : vector<1x4xf32> to vector<8x4xf32>
      %140 = arith.mulf %138, %139 : vector<8x4xf32>
      %141 = arith.addf %128, %140 : vector<8x4xf32>
      %142 = vector.extract_strided_slice %135 {offsets = [0, 1], sizes = [8, 1], strides = [1, 1]} : vector<8x4xf32> to vector<8x1xf32>
      %143 = vector.extract_strided_slice %134 {offsets = [1, 0], sizes = [1, 4], strides = [1, 1]} : vector<4x4xf32> to vector<1x4xf32>
      %144 = vector.broadcast %142 : vector<8x1xf32> to vector<8x4xf32>
      %145 = vector.broadcast %143 : vector<1x4xf32> to vector<8x4xf32>
      %146 = arith.mulf %144, %145 : vector<8x4xf32>
      %147 = arith.addf %141, %146 : vector<8x4xf32>
      %148 = vector.extract_strided_slice %135 {offsets = [0, 2], sizes = [8, 1], strides = [1, 1]} : vector<8x4xf32> to vector<8x1xf32>
      %149 = vector.extract_strided_slice %134 {offsets = [2, 0], sizes = [1, 4], strides = [1, 1]} : vector<4x4xf32> to vector<1x4xf32>
      %150 = vector.broadcast %148 : vector<8x1xf32> to vector<8x4xf32>
      %151 = vector.broadcast %149 : vector<1x4xf32> to vector<8x4xf32>
      %152 = arith.mulf %150, %151 : vector<8x4xf32>
      %153 = arith.addf %147, %152 : vector<8x4xf32>
      %154 = vector.extract_strided_slice %135 {offsets = [0, 3], sizes = [8, 1], strides = [1, 1]} : vector<8x4xf32> to vector<8x1xf32>
      %155 = vector.extract_strided_slice %134 {offsets = [3, 0], sizes = [1, 4], strides = [1, 1]} : vector<4x4xf32> to vector<1x4xf32>
      %156 = vector.broadcast %154 : vector<8x1xf32> to vector<8x4xf32>
      %157 = vector.broadcast %155 : vector<1x4xf32> to vector<8x4xf32>
      %158 = arith.mulf %156, %157 : vector<8x4xf32>
      %159 = arith.addf %153, %158 : vector<8x4xf32>
      %c0_i32_29 = arith.constant 0 : i32
      %160 = arith.addi %arg9, %c0_i32_29 : i32
      %c0_30 = arith.constant 0 : index
      %c0_31 = arith.constant 0 : index
      %161 = arith.index_cast %160 : i32 to index
      %c1_32 = arith.constant 1 : index
      %c0_33 = arith.constant 0 : index
      %162 = vector.load %arg4[%c0_30, %c0_31, %161, %c1_32, %c0_33] : memref<1x1x4x9x4xbf16, #tpu.memory_space<vmem>>, vector<1x1x1x8x4xbf16>
      %163 = vector.shape_cast %162 : vector<1x1x1x8x4xbf16> to vector<8x4xbf16>
      %164 = vector.extract_strided_slice %1 {offsets = [5, 0, 0], sizes = [1, 4, 4], strides = [1, 1, 1]} : vector<9x4x4xf32> to vector<1x4x4xf32>
      %165 = vector.shape_cast %164 : vector<1x4x4xf32> to vector<4x4xf32>
      %166 = arith.extf %163 : vector<8x4xbf16> to vector<8x4xf32>
      %167 = vector.extract_strided_slice %166 {offsets = [0, 0], sizes = [8, 1], strides = [1, 1]} : vector<8x4xf32> to vector<8x1xf32>
      %168 = vector.extract_strided_slice %165 {offsets = [0, 0], sizes = [1, 4], strides = [1, 1]} : vector<4x4xf32> to vector<1x4xf32>
      %169 = vector.broadcast %167 : vector<8x1xf32> to vector<8x4xf32>
      %170 = vector.broadcast %168 : vector<1x4xf32> to vector<8x4xf32>
      %171 = arith.mulf %169, %170 : vector<8x4xf32>
      %172 = arith.addf %159, %171 : vector<8x4xf32>
      %173 = vector.extract_strided_slice %166 {offsets = [0, 1], sizes = [8, 1], strides = [1, 1]} : vector<8x4xf32> to vector<8x1xf32>
      %174 = vector.extract_strided_slice %165 {offsets = [1, 0], sizes = [1, 4], strides = [1, 1]} : vector<4x4xf32> to vector<1x4xf32>
      %175 = vector.broadcast %173 : vector<8x1xf32> to vector<8x4xf32>
      %176 = vector.broadcast %174 : vector<1x4xf32> to vector<8x4xf32>
      %177 = arith.mulf %175, %176 : vector<8x4xf32>
      %178 = arith.addf %172, %177 : vector<8x4xf32>
      %179 = vector.extract_strided_slice %166 {offsets = [0, 2], sizes = [8, 1], strides = [1, 1]} : vector<8x4xf32> to vector<8x1xf32>
      %180 = vector.extract_strided_slice %165 {offsets = [2, 0], sizes = [1, 4], strides = [1, 1]} : vector<4x4xf32> to vector<1x4xf32>
      %181 = vector.broadcast %179 : vector<8x1xf32> to vector<8x4xf32>
      %182 = vector.broadcast %180 : vector<1x4xf32> to vector<8x4xf32>
      %183 = arith.mulf %181, %182 : vector<8x4xf32>
      %184 = arith.addf %178, %183 : vector<8x4xf32>
      %185 = vector.extract_strided_slice %166 {offsets = [0, 3], sizes = [8, 1], strides = [1, 1]} : vector<8x4xf32> to vector<8x1xf32>
      %186 = vector.extract_strided_slice %165 {offsets = [3, 0], sizes = [1, 4], strides = [1, 1]} : vector<4x4xf32> to vector<1x4xf32>
      %187 = vector.broadcast %185 : vector<8x1xf32> to vector<8x4xf32>
      %188 = vector.broadcast %186 : vector<1x4xf32> to vector<8x4xf32>
      %189 = arith.mulf %187, %188 : vector<8x4xf32>
      %190 = arith.addf %184, %189 : vector<8x4xf32>
      %c1_i32_34 = arith.constant 1 : i32
      %191 = arith.addi %arg9, %c1_i32_34 : i32
      %c0_35 = arith.constant 0 : index
      %c0_36 = arith.constant 0 : index
      %192 = arith.index_cast %191 : i32 to index
      %c0_37 = arith.constant 0 : index
      %c0_38 = arith.constant 0 : index
      %193 = vector.load %arg2[%c0_35, %c0_36, %192, %c0_37, %c0_38] : memref<1x1x5x9x4xbf16, #tpu.memory_space<vmem>>, vector<1x1x1x8x4xbf16>
      %194 = vector.shape_cast %193 : vector<1x1x1x8x4xbf16> to vector<8x4xbf16>
      %195 = vector.extract_strided_slice %1 {offsets = [6, 0, 0], sizes = [1, 4, 4], strides = [1, 1, 1]} : vector<9x4x4xf32> to vector<1x4x4xf32>
      %196 = vector.shape_cast %195 : vector<1x4x4xf32> to vector<4x4xf32>
      %197 = arith.extf %194 : vector<8x4xbf16> to vector<8x4xf32>
      %198 = vector.extract_strided_slice %197 {offsets = [0, 0], sizes = [8, 1], strides = [1, 1]} : vector<8x4xf32> to vector<8x1xf32>
      %199 = vector.extract_strided_slice %196 {offsets = [0, 0], sizes = [1, 4], strides = [1, 1]} : vector<4x4xf32> to vector<1x4xf32>
      %200 = vector.broadcast %198 : vector<8x1xf32> to vector<8x4xf32>
      %201 = vector.broadcast %199 : vector<1x4xf32> to vector<8x4xf32>
      %202 = arith.mulf %200, %201 : vector<8x4xf32>
      %203 = arith.addf %190, %202 : vector<8x4xf32>
      %204 = vector.extract_strided_slice %197 {offsets = [0, 1], sizes = [8, 1], strides = [1, 1]} : vector<8x4xf32> to vector<8x1xf32>
      %205 = vector.extract_strided_slice %196 {offsets = [1, 0], sizes = [1, 4], strides = [1, 1]} : vector<4x4xf32> to vector<1x4xf32>
      %206 = vector.broadcast %204 : vector<8x1xf32> to vector<8x4xf32>
      %207 = vector.broadcast %205 : vector<1x4xf32> to vector<8x4xf32>
      %208 = arith.mulf %206, %207 : vector<8x4xf32>
      %209 = arith.addf %203, %208 : vector<8x4xf32>
      %210 = vector.extract_strided_slice %197 {offsets = [0, 2], sizes = [8, 1], strides = [1, 1]} : vector<8x4xf32> to vector<8x1xf32>
      %211 = vector.extract_strided_slice %196 {offsets = [2, 0], sizes = [1, 4], strides = [1, 1]} : vector<4x4xf32> to vector<1x4xf32>
      %212 = vector.broadcast %210 : vector<8x1xf32> to vector<8x4xf32>
      %213 = vector.broadcast %211 : vector<1x4xf32> to vector<8x4xf32>
      %214 = arith.mulf %212, %213 : vector<8x4xf32>
      %215 = arith.addf %209, %214 : vector<8x4xf32>
      %216 = vector.extract_strided_slice %197 {offsets = [0, 3], sizes = [8, 1], strides = [1, 1]} : vector<8x4xf32> to vector<8x1xf32>
      %217 = vector.extract_strided_slice %196 {offsets = [3, 0], sizes = [1, 4], strides = [1, 1]} : vector<4x4xf32> to vector<1x4xf32>
      %218 = vector.broadcast %216 : vector<8x1xf32> to vector<8x4xf32>
      %219 = vector.broadcast %217 : vector<1x4xf32> to vector<8x4xf32>
      %220 = arith.mulf %218, %219 : vector<8x4xf32>
      %221 = arith.addf %215, %220 : vector<8x4xf32>
      %c1_i32_39 = arith.constant 1 : i32
      %222 = arith.addi %arg9, %c1_i32_39 : i32
      %c0_40 = arith.constant 0 : index
      %c0_41 = arith.constant 0 : index
      %223 = arith.index_cast %222 : i32 to index
      %c0_42 = arith.constant 0 : index
      %c0_43 = arith.constant 0 : index
      %224 = vector.load %arg3[%c0_40, %c0_41, %223, %c0_42, %c0_43] : memref<1x1x5x8x4xbf16, #tpu.memory_space<vmem>>, vector<1x1x1x8x4xbf16>
      %225 = vector.shape_cast %224 : vector<1x1x1x8x4xbf16> to vector<8x4xbf16>
      %226 = vector.extract_strided_slice %1 {offsets = [7, 0, 0], sizes = [1, 4, 4], strides = [1, 1, 1]} : vector<9x4x4xf32> to vector<1x4x4xf32>
      %227 = vector.shape_cast %226 : vector<1x4x4xf32> to vector<4x4xf32>
      %228 = arith.extf %225 : vector<8x4xbf16> to vector<8x4xf32>
      %229 = vector.extract_strided_slice %228 {offsets = [0, 0], sizes = [8, 1], strides = [1, 1]} : vector<8x4xf32> to vector<8x1xf32>
      %230 = vector.extract_strided_slice %227 {offsets = [0, 0], sizes = [1, 4], strides = [1, 1]} : vector<4x4xf32> to vector<1x4xf32>
      %231 = vector.broadcast %229 : vector<8x1xf32> to vector<8x4xf32>
      %232 = vector.broadcast %230 : vector<1x4xf32> to vector<8x4xf32>
      %233 = arith.mulf %231, %232 : vector<8x4xf32>
      %234 = arith.addf %221, %233 : vector<8x4xf32>
      %235 = vector.extract_strided_slice %228 {offsets = [0, 1], sizes = [8, 1], strides = [1, 1]} : vector<8x4xf32> to vector<8x1xf32>
      %236 = vector.extract_strided_slice %227 {offsets = [1, 0], sizes = [1, 4], strides = [1, 1]} : vector<4x4xf32> to vector<1x4xf32>
      %237 = vector.broadcast %235 : vector<8x1xf32> to vector<8x4xf32>
      %238 = vector.broadcast %236 : vector<1x4xf32> to vector<8x4xf32>
      %239 = arith.mulf %237, %238 : vector<8x4xf32>
      %240 = arith.addf %234, %239 : vector<8x4xf32>
      %241 = vector.extract_strided_slice %228 {offsets = [0, 2], sizes = [8, 1], strides = [1, 1]} : vector<8x4xf32> to vector<8x1xf32>
      %242 = vector.extract_strided_slice %227 {offsets = [2, 0], sizes = [1, 4], strides = [1, 1]} : vector<4x4xf32> to vector<1x4xf32>
      %243 = vector.broadcast %241 : vector<8x1xf32> to vector<8x4xf32>
      %244 = vector.broadcast %242 : vector<1x4xf32> to vector<8x4xf32>
      %245 = arith.mulf %243, %244 : vector<8x4xf32>
      %246 = arith.addf %240, %245 : vector<8x4xf32>
      %247 = vector.extract_strided_slice %228 {offsets = [0, 3], sizes = [8, 1], strides = [1, 1]} : vector<8x4xf32> to vector<8x1xf32>
      %248 = vector.extract_strided_slice %227 {offsets = [3, 0], sizes = [1, 4], strides = [1, 1]} : vector<4x4xf32> to vector<1x4xf32>
      %249 = vector.broadcast %247 : vector<8x1xf32> to vector<8x4xf32>
      %250 = vector.broadcast %248 : vector<1x4xf32> to vector<8x4xf32>
      %251 = arith.mulf %249, %250 : vector<8x4xf32>
      %252 = arith.addf %246, %251 : vector<8x4xf32>
      %c1_i32_44 = arith.constant 1 : i32
      %253 = arith.addi %arg9, %c1_i32_44 : i32
      %c0_45 = arith.constant 0 : index
      %c0_46 = arith.constant 0 : index
      %254 = arith.index_cast %253 : i32 to index
      %c1_47 = arith.constant 1 : index
      %c0_48 = arith.constant 0 : index
      %255 = vector.load %arg2[%c0_45, %c0_46, %254, %c1_47, %c0_48] : memref<1x1x5x9x4xbf16, #tpu.memory_space<vmem>>, vector<1x1x1x8x4xbf16>
      %256 = vector.shape_cast %255 : vector<1x1x1x8x4xbf16> to vector<8x4xbf16>
      %257 = vector.extract_strided_slice %1 {offsets = [8, 0, 0], sizes = [1, 4, 4], strides = [1, 1, 1]} : vector<9x4x4xf32> to vector<1x4x4xf32>
      %258 = vector.shape_cast %257 : vector<1x4x4xf32> to vector<4x4xf32>
      %259 = arith.extf %256 : vector<8x4xbf16> to vector<8x4xf32>
      %260 = vector.extract_strided_slice %259 {offsets = [0, 0], sizes = [8, 1], strides = [1, 1]} : vector<8x4xf32> to vector<8x1xf32>
      %261 = vector.extract_strided_slice %258 {offsets = [0, 0], sizes = [1, 4], strides = [1, 1]} : vector<4x4xf32> to vector<1x4xf32>
      %262 = vector.broadcast %260 : vector<8x1xf32> to vector<8x4xf32>
      %263 = vector.broadcast %261 : vector<1x4xf32> to vector<8x4xf32>
      %264 = arith.mulf %262, %263 : vector<8x4xf32>
      %265 = arith.addf %252, %264 : vector<8x4xf32>
      %266 = vector.extract_strided_slice %259 {offsets = [0, 1], sizes = [8, 1], strides = [1, 1]} : vector<8x4xf32> to vector<8x1xf32>
      %267 = vector.extract_strided_slice %258 {offsets = [1, 0], sizes = [1, 4], strides = [1, 1]} : vector<4x4xf32> to vector<1x4xf32>
      %268 = vector.broadcast %266 : vector<8x1xf32> to vector<8x4xf32>
      %269 = vector.broadcast %267 : vector<1x4xf32> to vector<8x4xf32>
      %270 = arith.mulf %268, %269 : vector<8x4xf32>
      %271 = arith.addf %265, %270 : vector<8x4xf32>
      %272 = vector.extract_strided_slice %259 {offsets = [0, 2], sizes = [8, 1], strides = [1, 1]} : vector<8x4xf32> to vector<8x1xf32>
      %273 = vector.extract_strided_slice %258 {offsets = [2, 0], sizes = [1, 4], strides = [1, 1]} : vector<4x4xf32> to vector<1x4xf32>
      %274 = vector.broadcast %272 : vector<8x1xf32> to vector<8x4xf32>
      %275 = vector.broadcast %273 : vector<1x4xf32> to vector<8x4xf32>
      %276 = arith.mulf %274, %275 : vector<8x4xf32>
      %277 = arith.addf %271, %276 : vector<8x4xf32>
      %278 = vector.extract_strided_slice %259 {offsets = [0, 3], sizes = [8, 1], strides = [1, 1]} : vector<8x4xf32> to vector<8x1xf32>
      %279 = vector.extract_strided_slice %258 {offsets = [3, 0], sizes = [1, 4], strides = [1, 1]} : vector<4x4xf32> to vector<1x4xf32>
      %280 = vector.broadcast %278 : vector<8x1xf32> to vector<8x4xf32>
      %281 = vector.broadcast %279 : vector<1x4xf32> to vector<8x4xf32>
      %282 = arith.mulf %280, %281 : vector<8x4xf32>
      %283 = arith.addf %277, %282 : vector<8x4xf32>
      %284 = vector.broadcast %2 : vector<1x4xf32> to vector<8x4xf32>
      %285 = arith.addf %283, %284 : vector<8x4xf32>
      %c0_49 = arith.constant 0 : index
      %286 = arith.index_cast %arg9 : i32 to index
      %c0_50 = arith.constant 0 : index
      %c0_51 = arith.constant 0 : index
      %287 = vector.load %arg8[%c0_49, %286, %c0_50, %c0_51] : memref<1x4x8x4xf32, #tpu.memory_space<vmem>>, vector<1x1x8x4xf32>
      %288 = vector.shape_cast %287 : vector<1x1x8x4xf32> to vector<8x4xf32>
      %289 = vector.shape_cast %285 : vector<8x4xf32> to vector<1x1x8x4xf32>
      tpu.vector_store %arg8[%c0_49, %286, %c0_50, %c0_51], %289 {strides = array<i32>} : memref<1x4x8x4xf32, #tpu.memory_space<vmem>>, vector<1x1x8x4xf32>,
    }
    %c4_i32_4 = arith.constant 4 : i32
    return
  }
  func.func @transform_0(%arg0: i32, %arg1: i32) -> (i32, i32, i32, i32, i32) {
    %c0_i32 = arith.constant 0 : i32
    %c0_i32_0 = arith.constant 0 : i32
    %c0_i32_1 = arith.constant 0 : i32
    %c0_i32_2 = arith.constant 0 : i32
    return %arg0, %arg1, %c0_i32, %c0_i32_0, %c0_i32_1 : i32, i32, i32, i32, i32
  }
  func.func @transform_1(%arg0: i32, %arg1: i32) -> (i32, i32, i32, i32, i32) {
    %c0_i32 = arith.constant 0 : i32
    %c0_i32_0 = arith.constant 0 : i32
    %c0_i32_1 = arith.constant 0 : i32
    %c0_i32_2 = arith.constant 0 : i32
    return %arg0, %arg1, %c0_i32, %c0_i32_0, %c0_i32_1 : i32, i32, i32, i32, i32
  }
  func.func @transform_2(%arg0: i32, %arg1: i32) -> (i32, i32, i32, i32, i32) {
    %c0_i32 = arith.constant 0 : i32
    %c0_i32_0 = arith.constant 0 : i32
    %c0_i32_1 = arith.constant 0 : i32
    %c0_i32_2 = arith.constant 0 : i32
    return %arg0, %arg1, %c0_i32, %c0_i32_0, %c0_i32_1 : i32, i32, i32, i32, i32
  }
  func.func @transform_3(%arg0: i32, %arg1: i32) -> (i32, i32, i32, i32, i32) {
    %c0_i32 = arith.constant 0 : i32
    %c0_i32_0 = arith.constant 0 : i32
    %c0_i32_1 = arith.constant 0 : i32
    %c0_i32_2 = arith.constant 0 : i32
    return %arg0, %arg1, %c0_i32, %c0_i32_0, %c0_i32_1 : i32, i32, i32, i32, i32
  }
  func.func @transform_4(%arg0: i32, %arg1: i32) -> (i32, i32, i32) {
    %c0_i32 = arith.constant 0 : i32
    %c0_i32_0 = arith.constant 0 : i32
    %c0_i32_1 = arith.constant 0 : i32
    %c0_i32_2 = arith.constant 0 : i32
    return %c0_i32, %c0_i32_0, %c0_i32_1 : i32, i32, i32
  }
  func.func @transform_5(%arg0: i32, %arg1: i32) -> (i32, i32) {
    %c0_i32 = arith.constant 0 : i32
    %c0_i32_0 = arith.constant 0 : i32
    %c0_i32_1 = arith.constant 0 : i32
    return %c0_i32, %c0_i32_0 : i32, i32
  }
  func.func @transform_6(%arg0: i32, %arg1: i32) -> (i32, i32, i32, i32) {
    %c0_i32 = arith.constant 0 : i32
    %c0_i32_0 = arith.constant 0 : i32
    %c0_i32_1 = arith.constant 0 : i32
    return %arg0, %arg1, %c0_i32, %c0_i32_0 : i32, i32, i32, i32
  }
}

</mosaic_0001>

<bundles_post_ra>
// kernel: downsample_forward.1
= control target key start
LH: loop header
LB: loop body
LE: loop exit
PB: predicated region body
PF: predicated region fallthrough
CT: control target
= control target key end

     0   :  { %s1468_s21 = smov 0   ;;  %s1470_s22 = smov 0   ;;  %s1747_s0 = inlined_call_operand.vmem [shape: bf16[2,2,5,9,4], index: 0, kind: input, shape index: {}]   ;;  %s1748_s1 = inlined_call_operand.vmem [shape: bf16[2,2,5,8,4], index: 1, kind: input, shape index: {}]   ;;  %s1749_s2 = inlined_call_operand.vmem [shape: bf16[2,2,4,9,4], index: 2, kind: input, shape index: {}]   ;;  %s1750_s3 = inlined_call_operand.vmem [shape: bf16[2,2,4,8,4], index: 3, kind: input, shape index: {}]   ;;  %s1751_s4 = inlined_call_operand.vmem [shape: bf16[9,4,4], index: 4, kind: input, shape index: {}]   ;;  %s1752_s5 = inlined_call_operand.vmem [shape: f32[1,4], index: 5, kind: input, shape index: {}]   ;;  %s1753_s6 = inlined_call_operand.vmem [shape: f32[2,8,8,4], index: 6, kind: output, shape index: {}]  }
   0x1   :  { %1754 = sst [smem:[#allocation4_spill]] %s1751_s4  ;;  %s1472_s23 = smov 0  }
   0x2   :  { %1755 = sst [smem:[#allocation5_spill]] %s1752_s5  ;;  %s1474_s24 = smov 0  }
   0x3   :  { %s1476_s25 = smov 0  }
   0x4 LB: > { %s25_s26 = sadd.s32 1, %s1415_s23  ;;  %s28_s27 = sadd.s32 1, %s1419_s24  ;;  %s1423_s25 = sphi %s1476_s25, %s16_s25   ;;  %s1419_s24 = sphi %s1474_s24, %s1767_s24   ;;  %s1415_s23 = sphi %s1472_s23, %s1766_s23   ;;  %s1411_s22 = sphi %s1470_s22, %s1765_s22   ;;  %s1407_s21 = sphi %s1468_s21, %s1764_s21  }
   0x5   : > { %p26_p0 = scmp.ge.s32.totalorder %s25_s26, 2  ;;  %p1152_p1 = scmp.ge.s32.totalorder %s1423_s25, 1 }
   0x6   : > { %p280_p2 = scmp.lt.s32.totalorder %s1423_s25, 5 }
   0x7   : > { %s1769_s26 = smov (%p26_p0, %s25_s26), 0  ;;  %s1771_s27 = smov (!%p26_p0, %s28_s27), %s1419_s24 }
   0x8   : > { %1756 = sst [smem:[#allocation2_spill]] %s1769_s26  ;;  %p281_p3 = pnand %p1152_p1, %p280_p2 }
   0x9   : > { %p30_p4 = scmp.ge.s32.totalorder %s1771_s27, 2  ;;  %p345_p5 = scmp.lt.s32.totalorder (!%p281_p3), %s1411_s22, 1 }
   0xa   : > { %284 = sbr.rel (%p281_p3) target bundleno = 253 (0xfd), region = 44  ;;  %p347_p6 = scmp.lt.s32.totalorder (!%p281_p3), %s1407_s21, 1 }
   0xb   : > { %s1773_s27 = smov (%p30_p4, %s1771_s27), 0  ;;  %s1758_s4 = sld [smem:[#allocation4_spill]] (!%p281_p3) }
   0xc   : > { %1757 = sst [smem:[#allocation3_spill]] %s1773_s27  ;;  %s1759_s5 = sld [smem:[#allocation5_spill]] (!%p281_p3) }
   0xd   : > { %s1594_s27 = smov (!%p281_p3), 0  }
  0x11   : > { %v391_v0 = vld [vmem:[%s1758_s4] sm:$0x3]  ;;  %v392_v1 = vld [vmem:[%s1758_s4 + $0x2] sm:$0x3]  ;;  %v393_v2 = vld [vmem:[%s1758_s4 + $0x4] sm:$0x3] }
  0x12   : > { %v394_v3 = vld [vmem:[%s1758_s4 + $0x6] sm:$0x3]  ;;  %v1514_v4 = vunpack.c.l.bf16 %v391_v0  ;;  %v1516_v5 = vunpack.c.l.bf16 %v392_v1  ;;  %s1775_s22 = smov (!%p345_p5, %s1411_s22), 1  ;;  %v395_v6 = vld [vmem:[%s1758_s4 + $0x8] sm:$0x3]  ;;  %v1526_v8 = vunpack.c.l.bf16 %v393_v2 }
  0x13   : > { %v396_v7 = vld [vmem:[%s1758_s4 + $0xa] sm:$0x3]  ;;  %v1528_v9 = vunpack.c.l.bf16 %v394_v3  ;;  %s1531_s17 = scalar_select %p347_p6, %s1407_s21, 1  ;;  %v397_v10 = vld [vmem:[%s1758_s4 + $0xc] sm:$0x3]  ;;  %v1539_v12 = vunpack.c.l.bf16 %v395_v6 }
  0x14   : > { %v398_v11 = vld [vmem:[%s1758_s4 + $0xe] sm:$0x3]  ;;  %v1541_v13 = vunpack.c.l.bf16 %v396_v7  ;;  %s1182_s29 = smul.u32 20, %s1775_s22  ;;  %s1156_s30 = sshll.u32 %s1775_s22, 4  ;;  %v399_v14 = vld [vmem:[%s1758_s4 + $0x10] sm:$0x3]  ;;  %v1548_v15 = vunpack.c.l.bf16 %v397_v10 }
  0x15   : > { %v1550_v16 = vunpack.c.l.bf16 %v398_v11  ;;  %v1555_v17 = vld [vmem:[%s1759_s5] ss:$0 sm:$0xff]  ;;  %s1181_s12 = smul.u32 10, %s1531_s17  ;;  %s1155_s13 = sshll.u32 %s1531_s17, 3  ;;  %v1559_v18 = vunpack.c.l.bf16 %v399_v14 }
  0x16   : > { %s1183_s14 = smul.u32 5, %s1531_s17  ;;  %s369_s15 = sadd.s32 %s1156_s30, %s1155_s13 }
  0x17   : > { %s351_s16 = sadd.s32 %s1182_s29, %s1181_s12  ;;  %s1184_s18 = smul.u32 10, %s1775_s22 }
  0x18   : > { %s1153_s19 = sshll.u32 %s351_s16, 2  ;;  %s1157_s20 = sshll.u32 %s369_s15, 2 }
  0x19   : > { %s1566_s9 = scalar_lea.vmem %s1747_s0, %s1153_s19  ;;  %s360_s10 = sadd.s32 %s1184_s18, %s1183_s14 }
  0x1a   : > { %s1154_s11 = sshll.u32 %s360_s10, 2  ;;  %s1571_s5 = scalar_lea.vmem %s1749_s2, %s1157_s20 }
  0x1b   : > { %s1576_s30 = scalar_lea.vmem %s1748_s1, %s1154_s11  ;;  %s1158_s29 = sshll.u32 %s1531_s17, 2 }
  0x1c   : > { %s1159_s12 = sshll.u32 %s1775_s22, 3  ;;  %s1760_s13 = sshll.u32 %s1407_s21, 2 }
  0x1d   : > { %p384_p7 = scmp.lt.s32.totalorder %s1760_s13, 7  ;;  %s378_s15 = sadd.s32 %s1159_s12, %s1158_s29 }
  0x1e   : > { %s1160_s16 = sshll.u32 %s378_s15, 2  ;;  %s1761_s18 = smov %s1760_s13 }
  0x1f   : > { %s1585_s14 = scalar_lea.vmem %s1750_s3, %s1160_s16  ;;  %s1777_s18 = smov (!%p384_p7, %s1761_s18), 7 }
  0x20   : > { %s387_s4 = sadd.s32 %s1159_s12, %s1777_s18 }
  0x21   : > { %s1163_s8 = sshll.u32 %s387_s4, 3 }
  0x22   : > { %s1592_s26 = scalar_lea.vmem %s1753_s6, %s1163_s8 }
  0x23 LB: >> { %v1429_v19 = vmov 2   ;;  %v1430_v20 = vmov 0   ;;  %s1602_s21 = sshll.u32 %s1427_s27, 3  ;;  %s1166_s22 = sshll.u32 %s1427_s27, 2  ;;  %v1431_v30 = vmov 3   ;;  %v1432_v31 = vmov 1   ;;  %s1427_s27 = sphi %s1594_s27, %s415_s27  }
  0x24   : >> { %1249 = vset.pattern.permute.xlu1 %v1429_v19  ;;  %1237 = vset.pattern.permute.xlu0 %v1430_v20  ;;  %s1607_s17 = scalar_lea.vmem %s1566_s9, %s1602_s21  ;;  %s463_s10 = scalar_lea.vmem %s1576_s30, %s1166_s22  ;;  %v426_v50 = vlaneseq  ;;  %vm529_vm0 = vcmask 1046528   ;;  %vm969_vm1 = vcmask 31744  }
  0x25   : >> { %v419_v21 = vld [vmem:[%s1607_s17] ss:$8 sps:$4 sm:$0xff]   ;;  %v508_v27 = vld [vmem:[%s1607_s17 + $0x4] sm:$0x1]  ;;  %s599_s11 = scalar_lea.vmem %s1571_s5, %s1602_s21  ;;  %s644_s29 = scalar_lea.vmem %s1585_s14, %s1166_s22  ;;  %v1174_v46 = vld [vmem:[%s1607_s17 + $0xc] sm:$0x1] }
  0x26   : >> { %v464_v22 = vld [vmem:[%s463_s10] sm:$0xff]   ;;  %v420_v23 = vunpack.c.l.bf16 %v419_v21  ;;  %v510_v29 = vunpack.c.l.bf16 %v508_v27  ;;  %v783_v43 = vunpack.c.h.bf16 %v419_v21  ;;  %v873_v48 = vunpack.c.l.bf16 %v1174_v46  ;;  %s968_s12 = scalar_lea.vmem %s1592_s26, %s1602_s21  ;;  %s415_s27 = sadd.s32 1, %s1427_s27  }
  0x27   : >> { %v465_v24 = vunpack.c.l.bf16 %v464_v22  ;;  %v507_v26 = vld [vmem:[%s1607_s17] ss:$8 sps:$4 sm:$0xff]   ;;  %v689_v39 = vld [vmem:[%s599_s11 + $0x4] sm:$0x1]  ;;  %v828_v44 = vunpack.c.h.bf16 %v464_v22  ;;  %v427_v51 = vshrl.u32 %v426_v50, 7  ;;  %p412_p8 = scmp.ge.s32.totalorder %s415_s27, 4  }
  0x28   : >> { %v509_v28 = vunpack.c.l.bf16 %v507_v26  ;;  %v600_v33 = vld [vmem:[%s599_s11] sm:$0xf]  ;;  %v691_v41 = vunpack.c.l.bf16 %v689_v39  ;;  %v872_v47 = vunpack.c.h.bf16 %v507_v26 }
  0x29   : >> { %v1250_v25 = vpack.i.bf16 %v465_v24, %v420_v23  ;;  %v645_v34 = vld [vmem:[%s644_s29] sm:$0xf]  ;;  %v601_v35 = vunpack.c.l.bf16 %v600_v33  ;;  %v1333_v45 = vpack.i.bf16 %v828_v44, %v783_v43  ;;  %v1634_v53 = vsub.s32 0, %v427_v51 }
  0x2a   : >> { %v1267_v32 = vpack.i.bf16 %v510_v29, %v509_v28  ;;  %v646_v36 = vunpack.c.l.bf16 %v645_v34  ;;  %v688_v38 = vld [vmem:[%s599_s11] sm:$0xf]  ;;  %v1369_v49 = vpack.i.bf16 %v873_v48, %v872_v47  ;;  %v1636_v55 = vsub.s32 1, %v427_v51 }
  0x2b   : >> { %1251 = vperm.xlu1 %1249, %v1250_v25   ;;  %1239 = vperm.xlu0 %1237, %v1250_v25   ;;  %v690_v40 = vunpack.c.l.bf16 %v688_v38  ;;  %v1638_v56 = vsub.s32 2, %v427_v51  ;;  %v429_v57 = vrot.slane %v1514_v4, %v1634_v53  ;;  %v1642_v59 = vsub.s32 3, %v427_v51 }
  0x2c   : >> { %v1297_v37 = vpack.i.bf16 %v646_v36, %v601_v35  ;;  %v439_v60 = vrot.slane %v1514_v4, %v1636_v55  ;;  %v474_v11 = vrot.slane %v1516_v5, %v1634_v53  ;;  %v524_v22 = vrot.slane %v1526_v8, %v1634_v53 }
  0x2d   : >> { %v1315_v42 = vpack.i.bf16 %v691_v41, %v690_v40  ;;  %v449_v63 = vrot.slane %v1514_v4, %v1638_v56  ;;  %v459_v3 = vrot.slane %v1514_v4, %v1642_v59  ;;  %v494_v10 = vrot.slane %v1516_v5, %v1638_v56 }
  0x2e   : >> { %v504_v24 = vrot.slane %v1516_v5, %v1642_v59  ;;  %v567_v35 = vrot.slane %v1526_v8, %v1638_v56  ;;  %v588_v43 = vrot.slane %v1526_v8, %v1642_v59 }
  0x2f   : >> { %1255 = vset.pattern.permute.xlu1 %v1431_v30  ;;  %1243 = vset.pattern.permute.xlu0 %v1432_v31 }
  0x30   : >> { %1257 = vperm.xlu1 %1255, %v1250_v25   ;;  %1245 = vperm.xlu0 %1243, %v1250_v25   ;;  %v484_v25 = vrot.slane %v1516_v5, %v1636_v55 }
  0x34   : >> { %1261 = vset.pattern.permute.xlu1 %v1430_v20  ;;  %1268 = vperm.xlu0 %1243, %v1267_v32  }
  0x35   : >> { %1263 = vperm.xlu1 %1261, %v1267_v32  }
  0x38   : >> { %1278 = vset.pattern.permute.xlu0 %v1431_v30 }
  0x39   : >> { %1272 = vset.pattern.permute.xlu1 %v1429_v19  ;;  %1280 = vperm.xlu0 %1278, %v1267_v32  }
  0x3a   : >> { %1274 = vperm.xlu1 %1272, %v1267_v32  }
  0x3d   : >> { %1296 = vset.pattern.permute.xlu0 %v1429_v19 }
  0x3e   : >> { %1284 = vset.pattern.permute.xlu1 %v1430_v20  ;;  %1298 = vperm.xlu0 %1296, %v1297_v37  }
  0x3f   : >> { %1286 = vperm.xlu1 %1284, %v1297_v37  }
  0x42   : >> { %1314 = vset.pattern.permute.xlu0 %v1432_v31 }
  0x43   : >> { %1290 = vset.pattern.permute.xlu1 %v1432_v31  ;;  %1316 = vperm.xlu0 %1314, %v1315_v42  }
  0x44   : >> { %1292 = vperm.xlu1 %1290, %v1297_v37  }
  0x47   : >> { %1332 = vset.pattern.permute.xlu0 %v1430_v20 }
  0x48   : >> { %1302 = vset.pattern.permute.xlu1 %v1431_v30  ;;  %1334 = vperm.xlu0 %1332, %v1333_v45  }
  0x49   : >> { %1304 = vperm.xlu1 %1302, %v1297_v37  }
  0x4c   : >> { %1350 = vset.pattern.permute.xlu0 %v1431_v30 }
  0x4d   : >> { %1308 = vset.pattern.permute.xlu1 %v1430_v20  ;;  %1352 = vperm.xlu0 %1350, %v1333_v45  }
  0x4e   : >> { %1310 = vperm.xlu1 %1308, %v1315_v42  }
  0x51   : >> { %1368 = vset.pattern.permute.xlu0 %v1429_v19 }
  0x52   : >> { %1320 = vset.pattern.permute.xlu1 %v1429_v19  ;;  %1370 = vperm.xlu0 %1368, %v1369_v49  }
  0x53   : >> { %1322 = vperm.xlu1 %1320, %v1315_v42  }
  0x56   : >> { %1380 = vset.pattern.permute.xlu0 %v1431_v30 }
  0x57   : >> { %1326 = vset.pattern.permute.xlu1 %v1431_v30 }
  0x58   : >> { %1328 = vperm.xlu1 %1326, %v1315_v42  }
  0x5c   : >> { %1338 = vset.pattern.permute.xlu1 %v1432_v31 }
  0x5d   : >> { %1340 = vperm.xlu1 %1338, %v1333_v45  }
  0x61   : >> { %1344 = vset.pattern.permute.xlu1 %v1429_v19 }
  0x62   : >> { %1346 = vperm.xlu1 %1344, %v1333_v45  }
  0x66   : >> { %1356 = vset.pattern.permute.xlu1 %v1430_v20 }
  0x67   : >> { %1358 = vperm.xlu1 %1356, %v1369_v49  }
  0x6b   : >> { %1362 = vset.pattern.permute.xlu1 %v1432_v31  ;;  %v546_v31 = vrot.slane %v1526_v8, %v1636_v55 }
  0x6c   : >> { %1364 = vperm.xlu1 %1362, %v1369_v49  }
  0x70   : >> { %1374 = vset.pattern.permute.xlu1 %v1431_v30 }
  0x71   : >> { %1376 = vperm.xlu1 %1374, %v1369_v49  }
  0xaa   : >> { %v1252_v52 = vpop.permute.xlu1 %1251  ;;  %v1240_v54 = vpop.permute.xlu0 %1239 }
  0xab   : >> { %v1241_v58 = vunpack.i.l.bf16 %v1240_v54  ;;  %v1253_v0 = vunpack.i.l.bf16 %v1252_v52  ;;  %v1242_v19 = vunpack.i.h.bf16 %v1240_v54  ;;  %v1254_v32 = vunpack.i.h.bf16 %v1252_v52 }
  0xad   : >> { %v430_v2 = vmul.f32 %v1241_v58, %v429_v57  ;;  %v450_v14 = vmul.f32 %v1253_v0, %v449_v63  ;;  %v475_v36 = vmul.f32 %v1242_v19, %v474_v11  ;;  %v495_v52 = vmul.f32 %v1254_v32, %v494_v10 }
  0xaf   : >> { %v1258_v61 = vpop.permute.xlu1 %1257  ;;  %v1246_v62 = vpop.permute.xlu0 %1245 }
  0xb0   : >> { %v1247_v1 = vunpack.i.l.bf16 %v1246_v62  ;;  %v1259_v6 = vunpack.i.l.bf16 %v1258_v61  ;;  %v1248_v29 = vunpack.i.h.bf16 %v1246_v62  ;;  %v1260_v41 = vunpack.i.h.bf16 %v1258_v61 }
  0xb2   : >> { %v440_v7 = vmul.f32 %v1247_v1, %v439_v60  ;;  %v460_v28 = vmul.f32 %v1259_v6, %v459_v3  ;;  %v485_v46 = vmul.f32 %v1248_v29, %v484_v25  ;;  %v505_v0 = vmul.f32 %v1260_v41, %v504_v24 }
  0xb3   : >> { %v1269_v21 = vpop.permute.xlu0 %1268  ;;  %v610_v24 = vrot.slane %v1528_v9, %v1634_v53 }
  0xb4   : >> { %v441_v20 = vadd.f32 %v440_v7, %v430_v2  ;;  %v1264_v23 = vpop.permute.xlu1 %1263  ;;  %v1271_v33 = vunpack.i.h.bf16 %v1269_v21  ;;  %v1270_v34 = vunpack.i.l.bf16 %v1269_v21 }
  0xb5   : >> { %v1266_v26 = vunpack.i.h.bf16 %v1264_v23  ;;  %v1265_v27 = vunpack.i.l.bf16 %v1264_v23 }
  0xb6   : >> { %v451_v30 = vadd.f32 %v450_v14, %v441_v20  ;;  %v548_v50 = vmul.f32 %v1271_v33, %v546_v31  ;;  %v547_v51 = vmul.f32 %v1270_v34, %v546_v31  ;;  %v630_v33 = vrot.slane %v1528_v9, %v1638_v56 }
  0xb7   : >> { %v526_v38 = vmul.f32 %v1266_v26, %v524_v22  ;;  %v525_v39 = vmul.f32 %v1265_v27, %v524_v22 }
  0xb8   : >> { %v461_v37 = vadd.f32 %v460_v28, %v451_v30  ;;  %v1281_v40 = vpop.permute.xlu0 %1280  ;;  %v552_v3 = vrot.slane %v548_v50, 1  ;;  %v551_v6 = vrot.slane %v547_v51, 1  ;;  %v620_v30 = vrot.slane %v1528_v9, %v1636_v55 }
  0xb9   : >> { %v1275_v42 = vpop.permute.xlu1 %1274  ;;  %v1283_v44 = vunpack.i.h.bf16 %v1281_v40  ;;  %v1282_v45 = vunpack.i.l.bf16 %v1281_v40  ;;  %v531_v57 = vrot.slane %v526_v38, 1  ;;  %v530_v58 = vrot.slane %v525_v39, 1 }
  0xba   : >> { %v476_v47 = vadd.f32 %v475_v36, %v461_v37  ;;  %v1277_v48 = vunpack.i.h.bf16 %v1275_v42  ;;  %v1276_v49 = vunpack.i.l.bf16 %v1275_v42  ;;  %v553_v22 = vsel %vm529_vm0, %v551_v6, %v552_v3 }
  0xbb   : >> { %v590_v61 = vmul.f32 %v1283_v44, %v588_v43  ;;  %v589_v63 = vmul.f32 %v1282_v45, %v588_v43  ;;  %v532_v11 = vsel %vm529_vm0, %v530_v58, %v531_v57  ;;  %v640_v38 = vrot.slane %v1528_v9, %v1642_v59 }
  0xbc   : >> { %v486_v54 = vadd.f32 %v485_v46, %v476_v47  ;;  %v569_v60 = vmul.f32 %v1277_v48, %v567_v35  ;;  %v568_v62 = vmul.f32 %v1276_v49, %v567_v35  ;;  %v655_v44 = vrot.slane %v1539_v12, %v1634_v53 }
  0xbd   : >> { %v594_v20 = vrot.slane %v590_v61, 1  ;;  %v593_v21 = vrot.slane %v589_v63, 1  ;;  %v1299_v25 = vpop.permute.xlu0 %1298  ;;  %v726_v45 = vrot.slane %v1541_v13, %v1636_v55  ;;  %v665_v50 = vrot.slane %v1539_v12, %v1636_v55 }
  0xbe   : >> { %v496_v1 = vadd.f32 %v495_v52, %v486_v54  ;;  %v1287_v2 = vpop.permute.xlu1 %1286  ;;  %v573_v14 = vrot.slane %v569_v60, 1  ;;  %v572_v19 = vrot.slane %v568_v62, 1  ;;  %v1300_v34 = vunpack.i.l.bf16 %v1299_v25 }
  0xbf   : >> { %v1288_v27 = vunpack.i.l.bf16 %v1287_v2  ;;  %v595_v29 = vsel %vm529_vm0, %v593_v21, %v594_v20  ;;  %v1289_v46 = vunpack.i.h.bf16 %v1287_v2  ;;  %v705_v52 = vrot.slane %v1541_v13, %v1634_v53 }
  0xc0   : >> { %v506_v7 = vadd.f32 %v505_v0, %v496_v1  ;;  %v574_v28 = vsel %vm529_vm0, %v572_v19, %v573_v14  ;;  %v631_v43 = vmul.f32 %v1300_v34, %v630_v33  ;;  %v675_v61 = vrot.slane %v1539_v12, %v1638_v56 }
  0xc1   : >> { %v611_v35 = vmul.f32 %v1288_v27, %v610_v24  ;;  %v1301_v63 = vunpack.i.h.bf16 %v1299_v25  ;;  %v656_v0 = vmul.f32 %v1289_v46, %v655_v44  ;;  %v685_v19 = vrot.slane %v1539_v12, %v1642_v59 }
  0xc2   : >> { %v534_v10 = vadd.f32 %v532_v11, %v506_v7  ;;  %v1317_v39 = vpop.permute.xlu0 %1316  ;;  %v747_v11 = vrot.slane %v1541_v13, %v1638_v56  ;;  %v768_v34 = vrot.slane %v1541_v13, %v1642_v59 }
  0xc3   : >> { %v1293_v23 = vpop.permute.xlu1 %1292  ;;  %v1319_v48 = vunpack.i.h.bf16 %v1317_v39  ;;  %v1318_v49 = vunpack.i.l.bf16 %v1317_v39 }
  0xc4   : >> { %v555_v26 = vadd.f32 %v553_v22, %v534_v10  ;;  %v1294_v32 = vunpack.i.l.bf16 %v1293_v23  ;;  %v1295_v51 = vunpack.i.h.bf16 %v1293_v23 }
  0xc5   : >> { %v728_v2 = vmul.f32 %v1319_v48, %v726_v45  ;;  %v727_v3 = vmul.f32 %v1318_v49, %v726_v45 }
  0xc6   : >> { %v576_v31 = vadd.f32 %v574_v28, %v555_v26  ;;  %v621_v41 = vmul.f32 %v1294_v32, %v620_v30  ;;  %v666_v14 = vmul.f32 %v1295_v51, %v665_v50  ;;  %v676_v26 = vmul.f32 %v1301_v63, %v675_v61 }
  0xc7   : >> { %v732_v24 = vrot.slane %v728_v2, 1  ;;  %v731_v27 = vrot.slane %v727_v3, 1  ;;  %v822_v2 = vrot.slane %v1548_v15, %v1642_v59 }
  0xc8   : >> { %v597_v36 = vadd.f32 %v595_v29, %v576_v31  ;;  %v1305_v37 = vpop.permute.xlu1 %1304 }
  0xc9   : >> { %v1306_v42 = vunpack.i.l.bf16 %v1305_v37  ;;  %v1307_v20 = vunpack.i.h.bf16 %v1305_v37  ;;  %v733_v44 = vsel %vm529_vm0, %v731_v27, %v732_v24 }
  0xca   : >> { %v612_v40 = vadd.f32 %v611_v35, %v597_v36  ;;  %v1335_v36 = vpop.permute.xlu0 %1334 }
  0xcb   : >> { %v641_v57 = vmul.f32 %v1306_v42, %v640_v38  ;;  %v686_v32 = vmul.f32 %v1307_v20, %v685_v19  ;;  %v1336_v48 = vunpack.i.l.bf16 %v1335_v36  ;;  %v837_v19 = vrot.slane %v1550_v16, %v1634_v53 }
  0xcc   : >> { %v622_v47 = vadd.f32 %v621_v41, %v612_v40  ;;  %v792_v40 = vrot.slane %v1548_v15, %v1634_v53  ;;  %v1337_v20 = vunpack.i.h.bf16 %v1335_v36 }
  0xcd   : >> { %v1311_v54 = vpop.permute.xlu1 %1310 }
  0xce   : >> { %v632_v58 = vadd.f32 %v631_v43, %v622_v47  ;;  %v1313_v60 = vunpack.i.h.bf16 %v1311_v54  ;;  %v1312_v62 = vunpack.i.l.bf16 %v1311_v54  ;;  %v793_v63 = vmul.f32 %v1336_v48, %v792_v40 }
  0xd0   : >> { %v642_v1 = vadd.f32 %v641_v57, %v632_v58  ;;  %v707_v6 = vmul.f32 %v1313_v60, %v705_v52  ;;  %v706_v7 = vmul.f32 %v1312_v62, %v705_v52  ;;  %v802_v57 = vrot.slane %v1548_v15, %v1636_v55  ;;  %v1353_v58 = vpop.permute.xlu0 %1352 }
  0xd1   : >> { %v1354_v3 = vunpack.i.l.bf16 %v1353_v58 }
  0xd2   : >> { %v657_v21 = vadd.f32 %v656_v0, %v642_v1  ;;  %v1323_v10 = vpop.permute.xlu1 %1322  ;;  %v711_v28 = vrot.slane %v707_v6, 1  ;;  %v710_v29 = vrot.slane %v706_v7, 1  ;;  %v812_v1 = vrot.slane %v1548_v15, %v1638_v56 }
  0xd3   : >> { %v1325_v22 = vunpack.i.h.bf16 %v1323_v10  ;;  %v1324_v23 = vunpack.i.l.bf16 %v1323_v10 }
  0xd4   : >> { %v667_v25 = vadd.f32 %v666_v14, %v657_v21  ;;  %v712_v41 = vsel %vm529_vm0, %v710_v29, %v711_v28  ;;  %v929_v29 = vrot.slane %v1559_v18, %v1638_v56 }
  0xd5   : >> { %v749_v30 = vmul.f32 %v1325_v22, %v747_v11  ;;  %v748_v31 = vmul.f32 %v1324_v23, %v747_v11  ;;  %v823_v22 = vmul.f32 %v1354_v3, %v822_v2  ;;  %v1371_v23 = vpop.permute.xlu0 %1370 }
  0xd6   : >> { %v677_v33 = vadd.f32 %v676_v26, %v667_v25  ;;  %v887_v26 = vrot.slane %v1559_v18, %v1634_v53  ;;  %v847_v25 = vrot.slane %v1550_v16, %v1636_v55  ;;  %v867_v53 = vrot.slane %v1550_v16, %v1642_v59 }
  0xd7   : >> { %v1329_v35 = vpop.permute.xlu1 %1328  ;;  %v753_v42 = vrot.slane %v749_v30, 1  ;;  %v752_v43 = vrot.slane %v748_v31, 1 }
  0xd8   : >> { %v687_v37 = vadd.f32 %v686_v32, %v677_v33  ;;  %v1331_v38 = vunpack.i.h.bf16 %v1329_v35  ;;  %v1330_v39 = vunpack.i.l.bf16 %v1329_v35  ;;  %v1373_v32 = vunpack.i.h.bf16 %v1371_v23 }
  0xd9   : >> { %v754_v54 = vsel %vm529_vm0, %v752_v43, %v753_v42  ;;  %v1372_v33 = vunpack.i.l.bf16 %v1371_v23  ;;  %v857_v35 = vrot.slane %v1550_v16, %v1638_v56  ;;  %v908_v43 = vrot.slane %v1559_v18, %v1636_v55 }
  0xda   : >> { %v714_v45 = vadd.f32 %v712_v41, %v687_v37  ;;  %v770_v46 = vmul.f32 %v1331_v38, %v768_v34  ;;  %v769_v47 = vmul.f32 %v1330_v39, %v768_v34  ;;  %v838_v34 = vmul.f32 %v1337_v20, %v837_v19 }
  0xdb   : >> { %v1355_v41 = vunpack.i.h.bf16 %v1353_v58  ;;  %v950_v58 = vrot.slane %v1559_v18, %v1642_v59 }
  0xdc   : >> { %v735_v49 = vadd.f32 %v733_v44, %v714_v45  ;;  %v774_v50 = vrot.slane %v770_v46, 1  ;;  %v773_v51 = vrot.slane %v769_v47, 1  ;;  %v1341_v52 = vpop.permute.xlu1 %1340  ;;  %v931_v45 = vmul.f32 %v1373_v32, %v929_v29 }
  0xdd   : >> { %v1342_v60 = vunpack.i.l.bf16 %v1341_v52  ;;  %v1343_v24 = vunpack.i.h.bf16 %v1341_v52  ;;  %v930_v46 = vmul.f32 %v1372_v33, %v929_v29  ;;  %v868_v52 = vmul.f32 %v1355_v41, %v867_v53 }
  0xde   : >> { %v775_v62 = vsel %vm529_vm0, %v773_v51, %v774_v50  ;;  %v756_v61 = vadd.f32 %v754_v54, %v735_v49 }
  0xdf   : >> { %v803_v7 = vmul.f32 %v1342_v60, %v802_v57  ;;  %v848_v40 = vmul.f32 %v1343_v24, %v847_v25 }
  0xe0   : >> { %v777_v0 = vadd.f32 %v775_v62, %v756_v61  ;;  %v935_v62 = vrot.slane %v931_v45, 1  ;;  %v934_v61 = vrot.slane %v930_v46, 1 }
  0xe1   : >> { %v1347_v6 = vpop.permute.xlu1 %1346 }
  0xe2   : >> { %v794_v11 = vadd.f32 %v793_v63, %v777_v0  ;;  %v1348_v14 = vunpack.i.l.bf16 %v1347_v6  ;;  %v1349_v36 = vunpack.i.h.bf16 %v1347_v6 }
  0xe4   : >> { %v804_v21 = vadd.f32 %v803_v7, %v794_v11  ;;  %v813_v10 = vmul.f32 %v1348_v14, %v812_v1  ;;  %v858_v47 = vmul.f32 %v1349_v36, %v857_v35  ;;  %v936_v14 = vsel %vm529_vm0, %v934_v61, %v935_v62 }
  0xe6   : >> { %v814_v27 = vadd.f32 %v813_v10, %v804_v21  ;;  %v1359_v28 = vpop.permute.xlu1 %1358 }
  0xe7   : >> { %v1361_v30 = vunpack.i.h.bf16 %v1359_v28  ;;  %v1360_v31 = vunpack.i.l.bf16 %v1359_v28 }
  0xe8   : >> { %v824_v37 = vadd.f32 %v823_v22, %v814_v27 }
  0xe9   : >> { %v889_v38 = vmul.f32 %v1361_v30, %v887_v26  ;;  %v888_v39 = vmul.f32 %v1360_v31, %v887_v26 }
  0xea   : >> { %v839_v42 = vadd.f32 %v838_v34, %v824_v37 }
  0xeb   : >> { %v1365_v44 = vpop.permute.xlu1 %1364  ;;  %v893_v50 = vrot.slane %v889_v38, 1  ;;  %v892_v51 = vrot.slane %v888_v39, 1 }
  0xec   : >> { %v849_v48 = vadd.f32 %v848_v40, %v839_v42  ;;  %v1367_v49 = vunpack.i.h.bf16 %v1365_v44  ;;  %v1366_v56 = vunpack.i.l.bf16 %v1365_v44 }
  0xed   : >> { %v894_v2 = vsel %vm529_vm0, %v892_v51, %v893_v50 }
  0xee   : >> { %v859_v54 = vadd.f32 %v858_v47, %v849_v48  ;;  %v910_v57 = vmul.f32 %v1367_v49, %v908_v43  ;;  %v909_v60 = vmul.f32 %v1366_v56, %v908_v43 }
  0xf0   : >> { %v869_v63 = vadd.f32 %v868_v52, %v859_v54  ;;  %v914_v55 = vrot.slane %v910_v57, 1  ;;  %v913_v0 = vrot.slane %v909_v60, 1  ;;  %v1377_v1 = vpop.permute.xlu1 %1376 }
  0xf1   : >> { %v1379_v3 = vunpack.i.h.bf16 %v1377_v1  ;;  %v1378_v6 = vunpack.i.l.bf16 %v1377_v1 }
  0xf2   : >> { %v896_v7 = vadd.f32 %v894_v2, %v869_v63  ;;  %v915_v11 = vsel %vm529_vm0, %v913_v0, %v914_v55 }
  0xf3   : >> { %v952_v19 = vmul.f32 %v1379_v3, %v950_v58  ;;  %v951_v20 = vmul.f32 %v1378_v6, %v950_v58 }
  0xf4   : >> { %v917_v21 = vadd.f32 %v915_v11, %v896_v7 }
  0xf5   : >> { %v956_v10 = vrot.slane %v952_v19, 1  ;;  %v955_v59 = vrot.slane %v951_v20, 1 }
  0xf6   : >> { %v938_v22 = vadd.f32 %v936_v14, %v917_v21  ;;  %414 = sbr.rel (!%p412_p8) target bundleno = 35 (0x23), region = 97 }
  0xf7   : >> { %v957_v23 = vsel %vm529_vm0, %v955_v59, %v956_v10 }
  0xf8   : >> { %v959_v26 = vadd.f32 %v957_v23, %v938_v22 }
  0xfa   : >> { %v966_v25 = vadd.f32 %v1555_v17, %v959_v26 }
  0xfc   : >> { %970 = vst.msk [vmem:[%s968_s12] sm:$0xff] %vm969_vm1, %v966_v25 }
  0xfd PF: > { %s16_s25 = sadd.s32 1, %s1423_s25   ;;  %s1762_s13 = sld [smem:[#allocation2_spill]] }
  0xfe   : > { %p13_p9 = scmp.ge.s32.totalorder %s16_s25, 6   ;;  %s1763_s15 = sld [smem:[#allocation3_spill]] }
  0xff   : > { %s1764_s21 = smov %s1415_s23  ;;  %s1765_s22 = smov %s1419_s24 }
 0x100   :  { %15 = sbr.rel (!%p13_p9) target bundleno = 4 (0x4), region = 108 }
 0x103   : > { %s1766_s23 = smov %s1762_s13 }
 0x104   : > { %s1767_s24 = smov %s1763_s15 }

</bundles_post_ra>
